<compile_context>
chip_gen: v6e
topology: v6e:2x2x1
jax: 0.10.0
libtpu: 0.0.40
codegen_flags: <defaults>
</compile_context>

<pallas_src>
import functools

import jax
import jax.numpy as jnp
from jax.experimental import pallas as pl
from jax.experimental.pallas import tpu as pltpu

IN_FEAT = 28 * 28          # 784
H1 = 128
H2 = 256
NUM_CLASSES = 10
OUT_PAD = 128              # lane-dense padded class dim
_NEG_BIG = -1e30           # finite "-inf" baked into padded b3 lanes


def _round_up(x, m):
    return ((x + m - 1) // m) * m


def mlp_kernel(x_ref, w1_ref, b1_ref, w2_ref, b2_ref, w3_ref, b3_ref, o_ref):
    # x tile: (TB, 784) f32 in VMEM; cast to bf16 here (single HBM read of x).
    x = x_ref[...].astype(jnp.bfloat16)

    h1 = jnp.dot(x, w1_ref[...], preferred_element_type=jnp.float32) + b1_ref[...]
    h1 = jnp.maximum(h1, 0.0)                                     # (TB, 128) f32

    h2 = jnp.dot(h1.astype(jnp.bfloat16), w2_ref[...],
                 preferred_element_type=jnp.float32) + b2_ref[...]
    h2 = jnp.maximum(h2, 0.0)                                     # (TB, 256) f32

    # Padded class lanes (>= 10) are masked via b3 == -1e30 (w3 cols are zero),
    # so no explicit iota/where is needed before the softmax normalizer.
    logits = jnp.dot(h2.astype(jnp.bfloat16), w3_ref[...],
                     preferred_element_type=jnp.float32) + b3_ref[...]  # (TB, 128)

    # Numerically stable log_softmax over the class axis.
    m = jnp.max(logits, axis=-1, keepdims=True)
    lse = m + jnp.log(jnp.sum(jnp.exp(logits - m), axis=-1, keepdims=True))
    o_ref[...] = logits - lse


@functools.partial(jax.jit, static_argnames=("block_batch",))
def mnist_classifier_forward(x_nchw, params, *, block_batch=2048):
    """x_nchw: (B, 1, 28, 28) float32. Returns (B, 10) log-probabilities."""
    w1, b1, w2, b2, w3, b3 = params
    batch = x_nchw.shape[0]

    # Flatten like torch .view(batch, -1). No dtype cast / feature pad here:
    # the kernel reads f32 pixels once and casts in VMEM.
    x = x_nchw.reshape(batch, -1)

    # Pad batch only to the 8-row sublane boundary (at most 7 extra rows).
    pb = _round_up(batch, 8)
    if pb != batch:
        x = jnp.pad(x, ((0, pb - batch), (0, 0)))

    # Tile size: as big as the budget allows, but keep >= 4 grid steps for
    # large batches so both v7x TensorCores get >= 2 pipelined steps each.
    tb = min(block_batch, pb)
    if pb >= 2048:
        tb = min(tb, _round_up(pl.cdiv(pb, 4), 8))
    tb = max(tb, 8)

    grid = (pl.cdiv(pb, tb),)

    in_specs = [
        pl.BlockSpec((tb, IN_FEAT), lambda i: (i, 0)),        # x tile, pipelined
        pl.BlockSpec((IN_FEAT, H1), lambda i: (0, 0)),        # w1 resident
        pl.BlockSpec((1, H1), lambda i: (0, 0)),              # b1 resident
        pl.BlockSpec((H1, H2), lambda i: (0, 0)),             # w2 resident
        pl.BlockSpec((1, H2), lambda i: (0, 0)),              # b2 resident
        pl.BlockSpec((H2, OUT_PAD), lambda i: (0, 0)),        # w3 resident (padded)
        pl.BlockSpec((1, OUT_PAD), lambda i: (0, 0)),         # b3 resident (masked)
    ]
    out_specs = pl.BlockSpec((tb, OUT_PAD), lambda i: (i, 0))  # lane-dense store

    flops = 2 * pb * (IN_FEAT * H1 + H1 * H2 + H2 * OUT_PAD)
    bytes_accessed = (
        pb * IN_FEAT * 4                                       # x (f32, read once)
        + (IN_FEAT * H1 + H1 * H2 + H2 * OUT_PAD) * 2          # weights (bf16)
        + (H1 + H2 + OUT_PAD) * 4                              # biases (f32)
        + pb * OUT_PAD * 4                                     # output (f32)
    )
    cost = pl.CostEstimate(flops=flops,
                           transcendentals=pb * OUT_PAD,
                           bytes_accessed=bytes_accessed)

    out = pl.pallas_call(
        mlp_kernel,
        out_shape=jax.ShapeDtypeStruct((pb, OUT_PAD), jnp.float32),
        grid=grid,
        in_specs=in_specs,
        out_specs=out_specs,
        compiler_params=pltpu.CompilerParams(
            dimension_semantics=("parallel",),
            vmem_limit_bytes=48 * 1024 * 1024),
        cost_estimate=cost,
    )(x, w1, b1, w2, b2, w3, b3)

    return out[:batch, :NUM_CLASSES]


def init_params(key):
    """Deterministic synthetic params in the kernel's layout.

    Weights stored pre-transposed (in, out) in bf16; biases (1, out) in f32.
      w1: (784, 128)
      w2: (128, 256)
      w3: (256, 128)  cols >= 10 are zero
      b3: (1, 128)    cols >= 10 are -1e30 (class mask baked into the bias)
    """
    k1, k2, k3, k4, k5, k6 = jax.random.split(key, 6)

    def linear(kw, kb, fan_in, fan_out, pad_out=None, pad_bias_value=0.0):
        bound = 1.0 / jnp.sqrt(float(fan_in))
        w = jax.random.uniform(kw, (fan_in, fan_out), jnp.float32, -bound, bound)
        b = jax.random.uniform(kb, (1, fan_out), jnp.float32, -bound, bound)
        pad_out = pad_out or fan_out
        w = jnp.pad(w, ((0, 0), (0, pad_out - fan_out)))
        b = jnp.pad(b, ((0, 0), (0, pad_out - fan_out)),
                    constant_values=pad_bias_value)
        return w.astype(jnp.bfloat16), b.astype(jnp.float32)

    w1, b1 = linear(k1, k2, IN_FEAT, H1)
    w2, b2 = linear(k3, k4, H1, H2)
    w3, b3 = linear(k5, k6, H2, NUM_CLASSES, pad_out=OUT_PAD,
                    pad_bias_value=_NEG_BIG)
    return (w1, b1, w2, b2, w3, b3)


if __name__ == "__main__":
    key = jax.random.PRNGKey(0)
    k_x, k_p = jax.random.split(key)

    batch = 8
    x = jax.random.normal(k_x, (batch, 1, 28, 28), jnp.float32)   # NCHW like torch
    params = init_params(k_p)

    out = mnist_classifier_forward(x, params)
    out = jax.block_until_ready(out)

    # Pure-JAX reference using the same bf16/f32 mixed-precision math.
    w1, b1, w2, b2, w3, b3 = params
    xf = x.reshape(batch, -1).astype(jnp.bfloat16)
    h1 = jnp.maximum(jnp.dot(xf, w1, preferred_element_type=jnp.float32) + b1, 0.0)
    h2 = jnp.maximum(
        jnp.dot(h1.astype(jnp.bfloat16), w2, preferred_element_type=jnp.float32) + b2,
        0.0)
    logits = jnp.dot(h2.astype(jnp.bfloat16), w3,
                     preferred_element_type=jnp.float32) + b3
    ref = jax.nn.log_softmax(logits[:, :NUM_CLASSES], axis=1)

    assert out.shape == (batch, NUM_CLASSES)
    assert jnp.allclose(out, ref, atol=2e-3, rtol=2e-3)
    # log-probs should sum to ~1 after exp
    assert jnp.allclose(jnp.sum(jnp.exp(out), axis=1), 1.0, atol=1e-3)

    print("KERNEL_OK")
</pallas_src>

<mosaic_0001>
module attributes {stable_mosaic.version = 11 : i64} {
  func.func @mlp_kernel(%arg0: i32, %arg1: memref<8x784xf32, #tpu.memory_space<vmem>>, %arg2: memref<784x128xbf16, #tpu.memory_space<vmem>>, %arg3: memref<1x128xf32, #tpu.memory_space<vmem>>, %arg4: memref<128x256xbf16, #tpu.memory_space<vmem>>, %arg5: memref<1x256xf32, #tpu.memory_space<vmem>>, %arg6: memref<256x128xbf16, #tpu.memory_space<vmem>>, %arg7: memref<1x128xf32, #tpu.memory_space<vmem>>, %arg8: memref<8x128xf32, #tpu.memory_space<vmem>>) attributes {dimension_semantics = [#tpu.dimension_semantics<parallel>], iteration_bounds = array<i64: 1>, scalar_prefetch = 0 : i64, scratch_operands = 0 : i64, tpu.core_type = #tpu.core_type<tc>, window_params = [{transform_indices = @transform_0, window_bounds = array<i64: 8, 784>}, {pipeline_mode = #tpu.pipeline_mode<synchronous>, transform_indices = @transform_1, window_bounds = array<i64: 784, 128>}, {pipeline_mode = #tpu.pipeline_mode<synchronous>, transform_indices = @transform_2, window_bounds = array<i64: 1, 128>}, {pipeline_mode = #tpu.pipeline_mode<synchronous>, transform_indices = @transform_3, window_bounds = array<i64: 128, 256>}, {pipeline_mode = #tpu.pipeline_mode<synchronous>, transform_indices = @transform_4, window_bounds = array<i64: 1, 256>}, {pipeline_mode = #tpu.pipeline_mode<synchronous>, transform_indices = @transform_5, window_bounds = array<i64: 256, 128>}, {pipeline_mode = #tpu.pipeline_mode<synchronous>, transform_indices = @transform_6, window_bounds = array<i64: 1, 128>}, {transform_indices = @transform_7, window_bounds = array<i64: 8, 128>}]} {
    %c0 = arith.constant 0 : index
    %c0_0 = arith.constant 0 : index
    %0 = vector.load %arg1[%c0, %c0_0] : memref<8x784xf32, #tpu.memory_space<vmem>>, vector<8x784xf32>
    %1 = arith.truncf %0 : vector<8x784xf32> to vector<8x784xbf16>
    %c0_1 = arith.constant 0 : index
    %c0_2 = arith.constant 0 : index
    %2 = vector.load %arg2[%c0_1, %c0_2] : memref<784x128xbf16, #tpu.memory_space<vmem>>, vector<784x128xbf16>
    %cst = arith.constant dense<0.000000e+00> : vector<8x128xf32>
    %3 = tpu.matmul %1, %2, %cst {dimension_numbers = #tpu.dot_dimension_numbers<[1], [0], [0], [1], [0, 0, 1, 1], [], []>} : vector<8x784xbf16>, vector<784x128xbf16>, vector<8x128xf32> -> vector<8x128xf32>
    %c0_3 = arith.constant 0 : index
    %c0_4 = arith.constant 0 : index
    %4 = vector.load %arg3[%c0_3, %c0_4] : memref<1x128xf32, #tpu.memory_space<vmem>>, vector<1x128xf32>
    %5 = vector.broadcast %4 : vector<1x128xf32> to vector<8x128xf32>
    %6 = arith.addf %3, %5 : vector<8x128xf32>
    %cst_5 = arith.constant 0.000000e+00 : f32
    %7 = vector.broadcast %cst_5 : f32 to vector<8x128xf32>
    %8 = arith.maximumf %6, %7 : vector<8x128xf32>
    %9 = arith.truncf %8 : vector<8x128xf32> to vector<8x128xbf16>
    %c0_6 = arith.constant 0 : index
    %c0_7 = arith.constant 0 : index
    %10 = vector.load %arg4[%c0_6, %c0_7] : memref<128x256xbf16, #tpu.memory_space<vmem>>, vector<128x256xbf16>
    %cst_8 = arith.constant dense<0.000000e+00> : vector<8x256xf32>
    %11 = tpu.matmul %9, %10, %cst_8 {dimension_numbers = #tpu.dot_dimension_numbers<[1], [0], [0], [1], [0, 0, 1, 1], [], []>} : vector<8x128xbf16>, vector<128x256xbf16>, vector<8x256xf32> -> vector<8x256xf32>
    %c0_9 = arith.constant 0 : index
    %c0_10 = arith.constant 0 : index
    %12 = vector.load %arg5[%c0_9, %c0_10] : memref<1x256xf32, #tpu.memory_space<vmem>>, vector<1x256xf32>
    %13 = vector.broadcast %12 : vector<1x256xf32> to vector<8x256xf32>
    %14 = arith.addf %11, %13 : vector<8x256xf32>
    %cst_11 = arith.constant 0.000000e+00 : f32
    %15 = vector.broadcast %cst_11 : f32 to vector<8x256xf32>
    %16 = arith.maximumf %14, %15 : vector<8x256xf32>
    %17 = arith.truncf %16 : vector<8x256xf32> to vector<8x256xbf16>
    %c0_12 = arith.constant 0 : index
    %c0_13 = arith.constant 0 : index
    %18 = vector.load %arg6[%c0_12, %c0_13] : memref<256x128xbf16, #tpu.memory_space<vmem>>, vector<256x128xbf16>
    %cst_14 = arith.constant dense<0.000000e+00> : vector<8x128xf32>
    %19 = tpu.matmul %17, %18, %cst_14 {dimension_numbers = #tpu.dot_dimension_numbers<[1], [0], [0], [1], [0, 0, 1, 1], [], []>} : vector<8x256xbf16>, vector<256x128xbf16>, vector<8x128xf32> -> vector<8x128xf32>
    %c0_15 = arith.constant 0 : index
    %c0_16 = arith.constant 0 : index
    %20 = vector.load %arg7[%c0_15, %c0_16] : memref<1x128xf32, #tpu.memory_space<vmem>>, vector<1x128xf32>
    %21 = vector.broadcast %20 : vector<1x128xf32> to vector<8x128xf32>
    %22 = arith.addf %19, %21 : vector<8x128xf32>
    %cst_17 = arith.constant dense<0xFF800000> : vector<8xf32>
    %23 = vector.multi_reduction <maximumf>, %22, %cst_17 [1] : vector<8x128xf32> to vector<8xf32>
    %24 = vector.shape_cast %23 : vector<8xf32> to vector<8x1xf32>
    %25 = vector.broadcast %24 : vector<8x1xf32> to vector<8x128xf32>
    %26 = arith.subf %22, %25 : vector<8x128xf32>
    %27 = math.exp %26 : vector<8x128xf32>
    %cst_18 = arith.constant dense<0.000000e+00> : vector<8xf32>
    %28 = vector.multi_reduction <add>, %27, %cst_18 [1] : vector<8x128xf32> to vector<8xf32>
    %29 = vector.shape_cast %28 : vector<8xf32> to vector<8x1xf32>
    %30 = math.log %29 : vector<8x1xf32>
    %31 = arith.addf %24, %30 : vector<8x1xf32>
    %32 = vector.broadcast %31 : vector<8x1xf32> to vector<8x128xf32>
    %33 = arith.subf %22, %32 : vector<8x128xf32>
    %c0_19 = arith.constant 0 : index
    %c0_20 = arith.constant 0 : index
    %34 = vector.load %arg8[%c0_19, %c0_20] : memref<8x128xf32, #tpu.memory_space<vmem>>, vector<8x128xf32>
    tpu.vector_store %arg8[%c0_19, %c0_20], %33 {strides = array<i32>} : memref<8x128xf32, #tpu.memory_space<vmem>>, vector<8x128xf32>,
    return
  }
  func.func @transform_0(%arg0: i32) -> (i32, i32) {
    %c0_i32 = arith.constant 0 : i32
    %c0_i32_0 = arith.constant 0 : i32
    return %arg0, %c0_i32 : i32, i32
  }
  func.func @transform_1(%arg0: i32) -> (i32, i32) {
    %c0_i32 = arith.constant 0 : i32
    %c0_i32_0 = arith.constant 0 : i32
    %c0_i32_1 = arith.constant 0 : i32
    return %c0_i32, %c0_i32_0 : i32, i32
  }
  func.func @transform_2(%arg0: i32) -> (i32, i32) {
    %c0_i32 = arith.constant 0 : i32
    %c0_i32_0 = arith.constant 0 : i32
    %c0_i32_1 = arith.constant 0 : i32
    return %c0_i32, %c0_i32_0 : i32, i32
  }
  func.func @transform_3(%arg0: i32) -> (i32, i32) {
    %c0_i32 = arith.constant 0 : i32
    %c0_i32_0 = arith.constant 0 : i32
    %c0_i32_1 = arith.constant 0 : i32
    return %c0_i32, %c0_i32_0 : i32, i32
  }
  func.func @transform_4(%arg0: i32) -> (i32, i32) {
    %c0_i32 = arith.constant 0 : i32
    %c0_i32_0 = arith.constant 0 : i32
    %c0_i32_1 = arith.constant 0 : i32
    return %c0_i32, %c0_i32_0 : i32, i32
  }
  func.func @transform_5(%arg0: i32) -> (i32, i32) {
    %c0_i32 = arith.constant 0 : i32
    %c0_i32_0 = arith.constant 0 : i32
    %c0_i32_1 = arith.constant 0 : i32
    return %c0_i32, %c0_i32_0 : i32, i32
  }
  func.func @transform_6(%arg0: i32) -> (i32, i32) {
    %c0_i32 = arith.constant 0 : i32
    %c0_i32_0 = arith.constant 0 : i32
    %c0_i32_1 = arith.constant 0 : i32
    return %c0_i32, %c0_i32_0 : i32, i32
  }
  func.func @transform_7(%arg0: i32) -> (i32, i32) {
    %c0_i32 = arith.constant 0 : i32
    %c0_i32_0 = arith.constant 0 : i32
    return %arg0, %c0_i32 : i32, i32
  }
}

</mosaic_0001>

<bundles_post_ra>
// kernel: mnist_classifier_forward.1
= control target key start
LH: loop header
LB: loop body
LE: loop exit
PB: predicated region body
PF: predicated region fallthrough
CT: control target
= control target key end

     0   :  { %v1260_v44 = vmov 0.0   ;;  %vm1261_vm0 = vmmov 0   ;;  %vm441_vm1 = vcmask 130048   ;;  %s1580_s0 = inlined_call_operand.vmem [shape: f32[8,784], index: 0, kind: input, shape index: {}]   ;;  %s1581_s1 = inlined_call_operand.vmem [shape: bf16[784,128], index: 1, kind: input, shape index: {}]   ;;  %s1582_s2 = inlined_call_operand.vmem [shape: f32[1,128], index: 2, kind: input, shape index: {}]   ;;  %s1583_s3 = inlined_call_operand.vmem [shape: bf16[128,256], index: 3, kind: input, shape index: {}]   ;;  %s1584_s4 = inlined_call_operand.vmem [shape: f32[1,256], index: 4, kind: input, shape index: {}]   ;;  %s1585_s5 = inlined_call_operand.vmem [shape: bf16[256,128], index: 5, kind: input, shape index: {}]   ;;  %s1586_s6 = inlined_call_operand.vmem [shape: f32[1,128], index: 6, kind: input, shape index: {}]   ;;  %s1587_s7 = inlined_call_operand.hbm [shape: f32[8,128], index: 7, kind: output, shape index: {}]  }
   0x1   :  { %v1145_v0 = vld [vmem:[%s1581_s1 + $0x78] sm:$0xff]   ;;  %v1149_v4 = vld [vmem:[%s1581_s1 + $0x70] sm:$0xff]   ;;  %v1153_v8 = vld [vmem:[%s1581_s1 + $0x68] sm:$0xff]  }
   0x2   :  { %v1146_v1 = vld [vmem:[%s1581_s1 + $0x38] sm:$0xff]   ;;  %1045 = vmatprep.subr.bf16.mxu0 %v1145_v0  ;;  %v1150_v5 = vld [vmem:[%s1581_s1 + $0x30] sm:$0xff]   ;;  %v1154_v9 = vld [vmem:[%s1581_s1 + $0x28] sm:$0xff]  }
   0x3   :  { %v1147_v2 = vld [vmem:[%s1581_s1 + $0xf8] sm:$0xff]   ;;  %1046 = vmatpush3.bf16.msra.mxu0 %v1146_v1  ;;  %v1151_v6 = vld [vmem:[%s1581_s1 + $0xf0] sm:$0xff]   ;;  %v1155_v10 = vld [vmem:[%s1581_s1 + $0xe8] sm:$0xff]  }
   0x4   :  { %v1148_v3 = vld [vmem:[%s1581_s1 + $0xb8] sm:$0xff]   ;;  %1067 = vmatprep.subr.bf16.mxu1 %v1147_v2  ;;  %1047 = vmatprep.subr.bf16.mxu0 %v1149_v4  ;;  %v1152_v7 = vld [vmem:[%s1581_s1 + $0xb0] sm:$0xff]   ;;  %v1156_v11 = vld [vmem:[%s1581_s1 + $0xa8] sm:$0xff]  }
   0x5   :  { %1068 = vmatpush3.bf16.msra.mxu1 %v1148_v3  ;;  %v1157_v12 = vld [vmem:[%s1581_s1 + $0x60] sm:$0xff]   ;;  %v1161_v16 = vld [vmem:[%s1581_s1 + $0x58] sm:$0xff]   ;;  %v1165_v20 = vld [vmem:[%s1581_s1 + $0x50] sm:$0xff]  }
   0x6   :  { %1069 = vmatprep.subr.bf16.mxu1 %v1151_v6  ;;  %v1158_v13 = vld [vmem:[%s1581_s1 + $0x20] sm:$0xff]   ;;  %v1162_v17 = vld [vmem:[%s1581_s1 + $0x18] sm:$0xff]   ;;  %v1166_v21 = vld [vmem:[%s1581_s1 + $0x10] sm:$0xff]  }
   0x7   :  { %1048 = vmatpush3.bf16.msra.mxu0 %v1150_v5  ;;  %v1159_v14 = vld [vmem:[%s1581_s1 + $0xe0] sm:$0xff]   ;;  %v1163_v18 = vld [vmem:[%s1581_s1 + $0xd8] sm:$0xff]   ;;  %v1167_v22 = vld [vmem:[%s1581_s1 + $0xd0] sm:$0xff]  }
   0x8   :  { %1049 = vmatprep.subr.bf16.mxu0 %v1153_v8  ;;  %v1160_v15 = vld [vmem:[%s1581_s1 + $0xa0] sm:$0xff]   ;;  %v1164_v19 = vld [vmem:[%s1581_s1 + $0x98] sm:$0xff]   ;;  %v1168_v23 = vld [vmem:[%s1581_s1 + $0x90] sm:$0xff]  }
   0x9   :  { %1070 = vmatpush3.bf16.msra.mxu1 %v1152_v7  ;;  %v1169_v24 = vld [vmem:[%s1581_s1 + $0x48] sm:$0xff]   ;;  %v1173_v28 = vld [vmem:[%s1581_s1 + $0x40] sm:$0xff]   ;;  %v1177_v36 = vld [vmem:[%s1581_s1 + $0x178] sm:$0xff]  }
   0xa   :  { %1071 = vmatprep.subr.bf16.mxu1 %v1155_v10  ;;  %v1170_v25 = vld [vmem:[%s1581_s1 + $0x8] sm:$0xff]   ;;  %v1174_v29 = vld [vmem:[%s1581_s1] sm:$0xff]   ;;  %v31_v37 = vld [vmem:[%s1580_s0 + $0x18] sm:$0xff] }
   0xb   :  { %1050 = vmatpush3.bf16.msra.mxu0 %v1154_v9  ;;  %v1171_v26 = vld [vmem:[%s1581_s1 + $0xc8] sm:$0xff]   ;;  %v1175_v30 = vld [vmem:[%s1581_s1 + $0xc0] sm:$0xff]   ;;  %v38_v38 = vpack.c.bf16 %v31_v37, %v31_v37  ;;  %v1178_v39 = vld [vmem:[%s1581_s1 + $0x138] sm:$0xff]  }
   0xc   :  { %1051 = vmatprep.subr.bf16.mxu0 %v1157_v12  ;;  %v1172_v27 = vld [vmem:[%s1581_s1 + $0x88] sm:$0xff]   ;;  %v1176_v33 = vld [vmem:[%s1581_s1 + $0x80] sm:$0xff]   ;;  %v30_v40 = vld [vmem:[%s1580_s0 + $0x10] sm:$0xff] }
   0xd   :  { %1072 = vmatpush3.bf16.msra.mxu1 %v1156_v11  ;;  %v29_v31 = vld [vmem:[%s1580_s0 + $0x8] sm:$0xff]  ;;  %v28_v34 = vld [vmem:[%s1580_s0] sm:$0xff]  ;;  %517 = vmatprep.mubr.bf16.mxu1 %v38_v38  ;;  %v37_v41 = vpack.c.bf16 %v30_v40, %v30_v40  ;;  %v1179_v42 = vld [vmem:[%s1581_s1 + $0x170] sm:$0xff]  }
   0xe   :  { %1073 = vmatprep.subr.bf16.mxu1 %v1159_v14  ;;  %v36_v32 = vpack.c.bf16 %v29_v31, %v29_v31  ;;  %v35_v35 = vpack.c.bf16 %v28_v34, %v28_v34  ;;  %v1180_v43 = vld [vmem:[%s1581_s1 + $0x130] sm:$0xff]   ;;  %v1181_v45 = vld [vmem:[%s1581_s1 + $0x168] sm:$0xff]   ;;  %v1183_v47 = vld [vmem:[%s1581_s1 + $0x160] sm:$0xff]  }
   0xf   :  { %1052 = vmatpush3.bf16.msra.mxu0 %v1158_v13  ;;  %v1182_v46 = vld [vmem:[%s1581_s1 + $0x128] sm:$0xff]   ;;  %v1184_v48 = vld [vmem:[%s1581_s1 + $0x120] sm:$0xff]   ;;  %v1185_v49 = vld [vmem:[%s1581_s1 + $0x158] sm:$0xff]  }
  0x10   :  { %1053 = vmatprep.subr.bf16.mxu0 %v1161_v16  ;;  %477 = vmatprep.mubr.bf16.mxu0 %v36_v32  ;;  %v1186_v50 = vld [vmem:[%s1581_s1 + $0x118] sm:$0xff]   ;;  %v1187_v51 = vld [vmem:[%s1581_s1 + $0x150] sm:$0xff]   ;;  %v1193_v53 = vld [vmem:[%s1581_s1 + $0x180] sm:$0xff]  }
  0x11   :  { %1074 = vmatpush3.bf16.msra.mxu1 %v1160_v15  ;;  %v1188_v52 = vld [vmem:[%s1581_s1 + $0x110] sm:$0xff]   ;;  %v33_v54 = vld [vmem:[%s1580_s0 + $0x28] sm:$0xff]  ;;  %v1191_v60 = vld [vmem:[%s1581_s1 + $0x140] sm:$0xff]  }
  0x12   :  { %1075 = vmatprep.subr.bf16.mxu1 %v1163_v18  ;;  %v1189_v55 = vld [vmem:[%s1581_s1 + $0x148] sm:$0xff]   ;;  %v40_v56 = vpack.c.bf16 %v33_v54, %v33_v54  ;;  %v34_v57 = vld [vmem:[%s1580_s0 + $0x30] sm:$0xff]  ;;  %v1192_v61 = vld [vmem:[%s1581_s1 + $0x100] sm:$0xff]  }
  0x13   :  { %1054 = vmatpush3.bf16.msra.mxu0 %v1162_v17  ;;  %v41_v58 = vpack.c.bf16 %v34_v57, %v34_v57  ;;  %v1190_v59 = vld [vmem:[%s1581_s1 + $0x108] sm:$0xff]   ;;  %v32_v62 = vld [vmem:[%s1580_s0 + $0x20] sm:$0xff] }
  0x14   :  { %1055 = vmatprep.subr.bf16.mxu0 %v1165_v20  ;;  %v39_v63 = vpack.c.bf16 %v32_v62, %v32_v62 }
  0x15   :  { %1076 = vmatpush3.bf16.msra.mxu1 %v1164_v19 }
  0x16   :  { %1077 = vmatprep.subr.bf16.mxu1 %v1167_v22 }
  0x17   :  { %1056 = vmatpush3.bf16.msra.mxu0 %v1166_v21 }
  0x18   :  { %1057 = vmatprep.subr.bf16.mxu0 %v1169_v24 }
  0x19   :  { %1078 = vmatpush3.bf16.msra.mxu1 %v1168_v23 }
  0x1a   :  { %1079 = vmatprep.subr.bf16.mxu1 %v1171_v26 }
  0x1b   :  { %1058 = vmatpush3.bf16.msra.mxu0 %v1170_v25 }
  0x1c   :  { %1059 = vmatprep.subr.bf16.mxu0 %v1173_v28 }
  0x1d   :  { %1080 = vmatpush3.bf16.msra.mxu1 %v1172_v27 }
  0x1e   :  { %1081 = vmatprep.subr.bf16.mxu1 %v1175_v30 }
  0x1f   :  { %1060 = vmatpush3.bf16.msra.mxu0 %v1174_v29 }
  0x20   :  { %1089 = vmatprep.subr.bf16.mxu0 %v1177_v36 }
  0x21   :  { %1082 = vmatpush3.bf16.msra.mxu1 %v1176_v33 }
  0x22   :  { %478 = vmatmul.mubr.bf16.vlgmr.msra.gmra.mxu0 %v35_v35  ;;  %1135 = vmatprep.subr.bf16.mxu1 %v1260_v44 }
  0x23   :  { %1090 = vmatpush3.bf16.msra.mxu0 %v1178_v39  ;;  %557 = vmatprep.mubr.bf16.mxu0 %v40_v56 }
  0x24   :  { %518 = vmatmul.mubr.bf16.vlgmr.msra.gmra.mxu1 %v37_v41  ;;  %1091 = vmatprep.subr.bf16.mxu0 %v1179_v42 }
  0x25   :  { %1137 = vmatprep.mubr.msk.bf16.mxu1 %vm1261_vm0, %v1260_v44  ;;  %1136 = vmatpush3.bf16.msra.mxu1 %v1193_v53 }
  0x27   :  { %1092 = vmatpush3.bf16.msra.mxu0 %v1180_v43 }
  0x28   :  { %1093 = vmatprep.subr.bf16.mxu0 %v1181_v45 }
  0x2b   :  { %1094 = vmatpush3.bf16.msra.mxu0 %v1182_v46 }
  0x2c   :  { %1095 = vmatprep.subr.bf16.mxu0 %v1183_v47  ;;  %1138 = vmatmul.mubr.msk.bf16.vlgmr.msra.gmra.mxu1 %vm441_vm1, %v41_v58 }
  0x2f   :  { %1096 = vmatpush3.bf16.msra.mxu0 %v1184_v48 }
  0x30   :  { %1097 = vmatprep.subr.bf16.mxu0 %v1185_v49 }
  0x33   :  { %1098 = vmatpush3.bf16.msra.mxu0 %v1186_v50 }
  0x34   :  { %1099 = vmatprep.subr.bf16.mxu0 %v1187_v51 }
  0x37   :  { %1100 = vmatpush3.bf16.msra.mxu0 %v1188_v52 }
  0x38   :  { %1101 = vmatprep.subr.bf16.mxu0 %v1189_v55 }
  0x3b   :  { %1102 = vmatpush3.bf16.msra.mxu0 %v1190_v59 }
  0x3c   :  { %1103 = vmatprep.subr.bf16.mxu0 %v1191_v60 }
  0x3f   :  { %1104 = vmatpush3.bf16.msra.mxu0 %v1192_v61 }
  0x42   :  { %558 = vmatmul.mubr.bf16.vlgmr.msra.gmra.mxu0 %v39_v63 }
  0x43   :  { %12 = vsyncpa [#allocation3], 0  ;;  %v1194_v0 = vld [vmem:[%s1583_s3 + $0x70] ss:$8 sps:$4 sm:$0xff]   ;;  %v1196_v1 = vld [vmem:[%s1583_s3 + $0x74] ss:$8 sps:$4 sm:$0xff]   ;;  %v625_v59 = vlaneseq }
  0x44   :  { %v1199_v2 = vld [vmem:[%s1583_s3 + $0x64] ss:$8 sps:$4 sm:$0xff]   ;;  %715 = vmatprep.subr.bf16.mxu1 %v1196_v1  ;;  %v1197_v3 = vld [vmem:[%s1583_s3 + $0x60] ss:$8 sps:$4 sm:$0xff]   ;;  %v1202_v4 = vld [vmem:[%s1583_s3 + $0x54] ss:$8 sps:$4 sm:$0xff]  }
  0x45   :  { %716 = vmatpush1.bf16.msra.mxu1 %v1194_v0  ;;  %v1200_v5 = vld [vmem:[%s1583_s3 + $0x50] ss:$8 sps:$4 sm:$0xff]   ;;  %v1205_v6 = vld [vmem:[%s1583_s3 + $0x44] ss:$8 sps:$4 sm:$0xff]   ;;  %v1203_v7 = vld [vmem:[%s1583_s3 + $0x40] ss:$8 sps:$4 sm:$0xff]  }
  0x46   :  { %717 = vmatprep.subr.bf16.mxu1 %v1199_v2  ;;  %v1208_v8 = vld [vmem:[%s1583_s3 + $0x34] ss:$8 sps:$4 sm:$0xff]   ;;  %v1206_v9 = vld [vmem:[%s1583_s3 + $0x30] ss:$8 sps:$4 sm:$0xff]   ;;  %v1209_v10 = vld [vmem:[%s1583_s3 + $0x20] ss:$8 sps:$4 sm:$0xff]  }
  0x47   :  { %v1211_v11 = vld [vmem:[%s1583_s3 + $0x24] ss:$8 sps:$4 sm:$0xff]   ;;  %v1214_v12 = vld [vmem:[%s1583_s3 + $0x14] ss:$8 sps:$4 sm:$0xff]   ;;  %v1212_v13 = vld [vmem:[%s1583_s3 + $0x10] ss:$8 sps:$4 sm:$0xff]  }
  0x48   :  { %v1217_v14 = vld [vmem:[%s1583_s3 + $0x4] ss:$8 sps:$4 sm:$0xff]   ;;  %v1215_v15 = vld [vmem:[%s1583_s3] ss:$8 sps:$4 sm:$0xff]   ;;  %v1262_v16 = vmov 0   ;;  %v1218_v17 = vld [vmem:[%s1585_s5 + $0x78] sm:$0xff]  }
  0x49   :  { %718 = vmatpush1.bf16.msra.mxu1 %v1197_v3  ;;  %747 = vmatprep.mubr.bf16.mxu1 %v1262_v16  ;;  %v1219_v18 = vld [vmem:[%s1585_s5 + $0x38] sm:$0xff]   ;;  %v1220_v19 = vld [vmem:[%s1585_s5 + $0x70] sm:$0xff]   ;;  %v1222_v21 = vld [vmem:[%s1585_s5 + $0x68] sm:$0xff]   ;;  %v626_v60 = vshrl.u32 %v625_v59, 7 }
  0x4a   :  { %719 = vmatprep.subr.bf16.mxu1 %v1202_v4  ;;  %1113 = vmatprep.subr.bf16.mxu0 %v1218_v17  ;;  %v1221_v20 = vld [vmem:[%s1585_s5 + $0x30] sm:$0xff]   ;;  %v1223_v22 = vld [vmem:[%s1585_s5 + $0x28] sm:$0xff]   ;;  %v1224_v23 = vld [vmem:[%s1585_s5 + $0x60] sm:$0xff]  }
  0x4b   :  { %1114 = vmatpush3.bf16.msra.mxu0 %v1219_v18  ;;  %v1225_v24 = vld [vmem:[%s1585_s5 + $0x20] sm:$0xff]   ;;  %v1226_v25 = vld [vmem:[%s1585_s5 + $0x58] sm:$0xff]   ;;  %v1228_v27 = vld [vmem:[%s1585_s5 + $0x50] sm:$0xff]   ;;  %v627_v61 = vsub.s32 0, %v626_v60  ;;  %v631_v63 = vsub.s32 1, %v626_v60 }
  0x4c   :  { %1115 = vmatprep.subr.bf16.mxu0 %v1220_v19  ;;  %v1227_v26 = vld [vmem:[%s1585_s5 + $0x18] sm:$0xff]   ;;  %v1229_v28 = vld [vmem:[%s1585_s5 + $0x10] sm:$0xff]   ;;  %v961_v42 = vld [vmem:[%s1582_s2] ss:$0 sm:$0xff] }
  0x4d   :  { %720 = vmatpush1.bf16.msra.mxu1 %v1200_v5  ;;  %v1230_v55 = vld [vmem:[%s1585_s5 + $0x48] sm:$0xff]   ;;  %v1232_v57 = vld [vmem:[%s1585_s5 + $0x40] sm:$0xff]  }
  0x4e   :  { %721 = vmatprep.subr.bf16.mxu1 %v1205_v6  ;;  %v1231_v56 = vld [vmem:[%s1585_s5 + $0x8] sm:$0xff]   ;;  %v1233_v58 = vld [vmem:[%s1585_s5] sm:$0xff]  }
  0x4f   :  { %1116 = vmatpush3.bf16.msra.mxu0 %v1221_v20  ;;  %v623_v62 = vld [vmem:[%s1584_s4] sm:$0x3]  ;;  %s1263_s4 = smov [#allocation2]  }
  0x50   :  { %1117 = vmatprep.subr.bf16.mxu0 %v1222_v21  ;;  %v628_v0 = vrot.slane %v623_v62, %v627_v61  ;;  %v632_v1 = vrot.slane %v623_v62, %v631_v63  ;;  %s953_s12 = sshll.u32 %s1263_s4, 4  ;;  %s954_s12 = int_to_ptr.vmem [resolvable:$true] %s953_s12 }
  0x51   :  { %722 = vmatpush1.bf16.msra.mxu1 %v1203_v7  ;;  %p1243_p1 = scmp.lt.s32.totalorder %s954_s12, %s954_s12 }
  0x52   :  { %723 = vmatprep.subr.bf16.mxu1 %v1208_v8 }
  0x53   :  { %1118 = vmatpush3.bf16.msra.mxu0 %v1223_v22 }
  0x54   :  { %1119 = vmatprep.subr.bf16.mxu0 %v1224_v23 }
  0x55   :  { %724 = vmatpush1.bf16.msra.mxu1 %v1206_v9 }
  0x56   :  { %725 = vmatprep.subr.bf16.mxu1 %v1211_v11 }
  0x57   :  { %1120 = vmatpush3.bf16.msra.mxu0 %v1225_v24 }
  0x58   :  { %1121 = vmatprep.subr.bf16.mxu0 %v1226_v25 }
  0x59   :  { %726 = vmatpush1.bf16.msra.mxu1 %v1209_v10 }
  0x5a   :  { %727 = vmatprep.subr.bf16.mxu1 %v1214_v12 }
  0x5b   :  { %1122 = vmatpush3.bf16.msra.mxu0 %v1227_v26 }
  0x5c   :  { %1123 = vmatprep.subr.bf16.mxu0 %v1228_v27 }
  0x5d   :  { %728 = vmatpush1.bf16.msra.mxu1 %v1212_v13  ;;  %v1028_v13 = vld [vmem:[%s1586_s6] ss:$0 sm:$0xff]  ;;  %s1238_s6 = scalar_lea.vmem %s954_s12, 128 }
  0x5e   :  { %729 = vmatprep.subr.bf16.mxu1 %v1217_v14  ;;  %p1239_p0 = scmp.ne.s32.totalorder %s954_s12, %s1238_s6  ;;  %p1244_p2 = scmp.lt.s32.totalorder %s1238_s6, %s1238_s6 }
  0x5f   :  { %1124 = vmatpush3.bf16.msra.mxu0 %v1229_v28 }
  0x60   :  { %1125 = vmatprep.subr.bf16.mxu0 %v1230_v55  ;;  %p1245_p3 = por %p1244_p2, %p1243_p1 }
  0x61   :  { %730 = vmatpush1.bf16.msra.mxu1 %v1215_v15 }
  0x62   :  { %p1246_p4 = pnand %p1245_p3, %p1239_p0 }
  0x63   :  { %1126 = vmatpush3.bf16.msra.mxu0 %v1231_v56 }
  0x64   :  { %1127 = vmatprep.subr.bf16.mxu0 %v1232_v57 }
  0x67   :  { %1128 = vmatpush3.bf16.msra.mxu0 %v1233_v58 }
  0xe2   :  { %v1061_v29 = vpop.f32.mrf.mxu0 }
  0xe4   :  { %v1062_v30 = vpop.f32.mrf.mxu0  ;;  %v1083_v31 = vpop.f32.mrf.mxu1 }
  0xe5   :  { %v1063_v41 = vadd.f32 %v1062_v30, %v1061_v29 }
  0xe6   :  { %v1064_v32 = vpop.f32.mrf.mxu0  ;;  %v1084_v33 = vpop.f32.mrf.mxu1 }
  0xe7   :  { %v480_v43 = vadd.f32 %v1063_v41, %v961_v42  ;;  %v1085_v44 = vadd.f32 %v1084_v33, %v1083_v31 }
  0xe8   :  { %v1065_v34 = vpop.f32.mrf.mxu0  ;;  %v1086_v35 = vpop.f32.mrf.mxu1 }
  0xe9   :  { %v520_v47 = vadd.f32 %v1085_v44, %v480_v43 }
  0xea   :  { %v1087_v36 = vpop.f32.mrf.mxu1 }
  0xec   :  { %v599_v37 = vpop.f32.mrf.mxu1 }
  0xee   :  { %v1139_v38 = vpop.f32.mrf.mxu1 }
  0xf0   :  { %v602_v39 = vpop.f32.mrf.mxu1 }
  0xf2   :  { %v1140_v40 = vpop.f32.mrf.mxu1 }
 0x102   :  { %v1105_v45 = vpop.f32.mrf.mxu0 }
 0x104   :  { %v1106_v46 = vpop.f32.mrf.mxu0 }
 0x105   :  { %v1107_v48 = vadd.f32 %v1106_v46, %v1105_v45 }
 0x106   :  { %v1108_v49 = vpop.f32.mrf.mxu0 }
 0x107   :  { %v560_v50 = vadd.f32 %v1107_v48, %v520_v47 }
 0x108   :  { %v1109_v51 = vpop.f32.mrf.mxu0 }
 0x109   :  { %v600_v52 = vadd.f32 %v599_v37, %v560_v50 }
 0x10b   :  { %v605_v53 = vmax.f32 %v600_v52, 0.0 }
 0x10d   :  { %v606_v54 = vpack.c.bf16 %v605_v53, %v605_v53 }
 0x10f   :  { %748 = vmatmul.mubr.bf16.vlgmr.msra.gmra.mxu1 %v606_v54 }
 0x1cf   :  { %v749_v2 = vpop.f32.mrf.mxu1 }
 0x1d0   :  { %v750_v3 = vadd.f32 %v749_v2, %v628_v0 }
 0x1d1   :  { %v751_v4 = vpop.f32.mrf.mxu1 }
 0x1d2   :  { %v752_v5 = vadd.f32 %v751_v4, %v632_v1  ;;  %v756_v6 = vmax.f32 %v750_v3, 0.0 }
 0x1d3   :  { %v753_v7 = vpop.f32.mrf.mxu1 }
 0x1d4   :  { %v757_v8 = vmax.f32 %v752_v5, 0.0  ;;  %v758_v11 = vpack.c.bf16 %v756_v6, %v756_v6 }
 0x1d5   :  { %v754_v9 = vpop.f32.mrf.mxu1 }
 0x1d6   :  { %v759_v10 = vpack.c.bf16 %v757_v8, %v757_v8 }
 0x1d8   :  { %927 = vmatprep.mubr.bf16.mxu0 %v759_v10 }
 0x1d9   :  { %928 = vmatmul.mubr.bf16.vlgmr.msra.gmra.mxu0 %v758_v11 }
 0x299   :  { %v1129_v12 = vpop.f32.mrf.mxu0 }
 0x29b   :  { %v1130_v14 = vpop.f32.mrf.mxu0 }
 0x29c   :  { %v1131_v15 = vadd.f32 %v1130_v14, %v1129_v12 }
 0x29d   :  { %v1132_v16 = vpop.f32.mrf.mxu0 }
 0x29e   :  { %v930_v17 = vadd.f32 %v1131_v15, %v1028_v13 }
 0x29f   :  { %v1133_v18 = vpop.f32.mrf.mxu0 }
 0x2a0   :  { %935 = vmax.xlane.f32.xlu0 %v930_v17 }
 0x329   :  { %v936_v19 = vpop.xlane.xlu0 %935 }
 0x32a   :  { %v937_v20 = vsub.f32 %v930_v17, %v936_v19 }
 0x32c   :  { %v938_v21 = vmul.f32 1.442695, %v937_v20 }
 0x32e   :  { %1234 = vpow2.f32 %v938_v21 }
 0x33b   :  { %v1235_v22 = vpop.eup %1234 }
 0x33c   :  { %940 = vadd.xlane.f32.xlu0 %v1235_v22 }
 0x3c5   :  { %v941_v23 = vpop.xlane.xlu0 %940 }
 0x3c6   :  { %1236 = vlog2.f32 %v941_v23 }
 0x3d3   :  { %v1237_v24 = vpop.eup %1236 }
 0x3d4   :  { %v943_v25 = vmul.f32 0.6931472, %v1237_v24 }
 0x3d6   :  { %v944_v26 = vadd.f32 %v943_v25, %v936_v19 }
 0x3d8   :  { %v945_v27 = vsub.f32 %v930_v17, %v944_v26 }
 0x3da   :  { %946 = vst [vmem:[#allocation2] sm:$0xff] %v945_v27 }
 0x3db   :  { %1249 = shalt.err (!%p1246_p4)
}
 0x3dc   :  { %956 = dma.vmem_to_hbm [thread:$0]  %s954_s12, 128, %s1587_s7, [#allocation3]  }
 0x3dd   :  { %1258 = dma.done.wait [#allocation3], 128  }
 0x3de   :  { %1259 = vsyncadd [#allocation3], 4294967168 }
 0x3df   :  { %960 = vsyncpa [#allocation3], 1 }

</bundles_post_ra>
